<compile_context>
chip_gen: v7x
topology: tpu7x:2x2x1
jax: 0.10.0
libtpu: 0.0.40
codegen_flags: <defaults>
</compile_context>

<pallas_src>
import jax
import jax.numpy as jnp
from jax.experimental import pallas as pl
from jax.experimental.pallas import tpu as pltpu


def _mish_kernel(x):
    # mish(x) = x * tanh(softplus(x)).  With u = exp(x):
    #   tanh(log(1+u)) = ((1+u)^2 - 1) / ((1+u)^2 + 1) = 1 - 2/(u^2 + 2u + 2)
    # Clamp keeps u^2 finite in f32; for x > 20, mish(x) == x to f32 precision.
    u = jnp.exp(jnp.minimum(x, 20.0))
    t = 1.0 - 2.0 * pl.reciprocal(u * u + 2.0 * u + 2.0, approx=True)
    return jnp.where(x > 20.0, x, x * t)


def mlp_kernel(x_ref, w1_ref, b1_ref, w2_ref, b2_ref, o_ref):
    # First linear: bf16 MXU inputs, f32 accumulation.
    h = jnp.dot(x_ref[...], w1_ref[...], preferred_element_type=jnp.float32)
    h = h + b1_ref[...]                       # f32 bias add (VPU)
    h = _mish_kernel(h)                       # f32 activation (VPU + EUP)
    # TODO(synk): Dropout is identity in eval mode; training-mode dropout
    # (stateful PRNG mask + 1/(1-p) scale) is intentionally not applied.
    # Second linear: cast activations to bf16 for the MXU, accumulate in f32.
    out = jnp.dot(h.astype(jnp.bfloat16), w2_ref[...],
                  preferred_element_type=jnp.float32)
    out = out + b2_ref[...]
    o_ref[...] = out.astype(o_ref.dtype)      # lane-dense (padded to 128) store


def simple_discriminative_forward(x, w1, b1, w2, b2, *, tb=128):
    """x: [B, in]; w1: [in, hid]; b1: [1, hid]; w2: [hid, out]; b2: [1, out]."""
    B, in_size = x.shape
    hid = w1.shape[1]
    out_size = w2.shape[1]

    # Pad batch to a multiple of the row tile and the output lane dim to a
    # multiple of 128 so the final store is a full unmasked vst.
    b_pad = pl.cdiv(B, tb) * tb
    out_pad = pl.cdiv(out_size, 128) * 128

    x_p = jnp.pad(x, ((0, b_pad - B), (0, 0))).astype(jnp.bfloat16)
    w1_bf = w1.astype(jnp.bfloat16)
    w2_bf = jnp.pad(w2, ((0, 0), (0, out_pad - out_size))).astype(jnp.bfloat16)
    b2_p = jnp.pad(b2, ((0, 0), (0, out_pad - out_size)))

    grid = (b_pad // tb,)

    out = pl.pallas_call(
        mlp_kernel,
        out_shape=jax.ShapeDtypeStruct((b_pad, out_pad), jnp.float32),
        grid=grid,
        in_specs=[
            # x / out are tiled along the batch axis (double-buffered pipeline).
            pl.BlockSpec((tb, in_size), lambda i: (i, 0)),
            # Weights / biases: constant index_map -> VMEM-resident across steps.
            pl.BlockSpec((in_size, hid), lambda i: (0, 0)),
            pl.BlockSpec((1, hid), lambda i: (0, 0)),
            pl.BlockSpec((hid, out_pad), lambda i: (0, 0)),
            pl.BlockSpec((1, out_pad), lambda i: (0, 0)),
        ],
        out_specs=pl.BlockSpec((tb, out_pad), lambda i: (i, 0)),
        compiler_params=pltpu.CompilerParams(
            dimension_semantics=("parallel",)),
    )(x_p, w1_bf, b1, w2_bf, b2_p)

    return out[:B, :out_size]


def init_params(key, input_size, output_size, arch=2):
    """Deterministic init mimicking PyTorch Linear default (uniform +/- 1/sqrt(fan_in))."""
    assert arch == 2
    hidden = input_size // 2
    k1, k2, k3, k4 = jax.random.split(key, 4)
    lim1 = 1.0 / jnp.sqrt(input_size)
    lim2 = 1.0 / jnp.sqrt(hidden)
    # Stored already transposed to [in, out] for the kernel.
    w1 = jax.random.uniform(k1, (input_size, hidden), jnp.float32, -lim1, lim1)
    b1 = jax.random.uniform(k2, (1, hidden), jnp.float32, -lim1, lim1)
    w2 = jax.random.uniform(k3, (hidden, output_size), jnp.float32, -lim2, lim2)
    b2 = jax.random.uniform(k4, (1, output_size), jnp.float32, -lim2, lim2)
    return w1, b1, w2, b2


def reference_forward(x, w1, b1, w2, b2):
    # Reference with the same bf16 matmul-input rounding as the kernel, so the
    # only remaining differences are accumulation order and the approx
    # reciprocal in mish.
    bf = lambda a: a.astype(jnp.bfloat16).astype(jnp.float32)
    h = bf(x) @ bf(w1) + b1
    sp = jnp.where(h > 20.0, h, jnp.log1p(jnp.exp(jnp.minimum(h, 20.0))))
    h = h * jnp.tanh(sp)
    return bf(h) @ bf(w2) + b2


if __name__ == "__main__":
    input_size = 32
    output_size = 8
    batch = 256  # exercises a 2-step grid with tb=128

    key = jax.random.PRNGKey(0)
    kx, kp = jax.random.split(key)
    x = jax.random.normal(kx, (batch, input_size), jnp.float32)
    w1, b1, w2, b2 = init_params(kp, input_size, output_size, arch=2)

    out = simple_discriminative_forward(x, w1, b1, w2, b2)
    out = jax.block_until_ready(out)

    ref = reference_forward(x, w1, b1, w2, b2)
    assert out.shape == (batch, output_size)
    assert jnp.allclose(out, ref, atol=1e-2, rtol=1e-2), "mismatch vs reference"

    print("KERNEL_OK")
</pallas_src>

<mosaic_0001>
module attributes {stable_mosaic.version = 11 : i64} {
  func.func @mlp_kernel(%arg0: i32, %arg1: memref<128x32xbf16, #tpu.memory_space<vmem>>, %arg2: memref<32x16xbf16, #tpu.memory_space<vmem>>, %arg3: memref<1x16xf32, #tpu.memory_space<vmem>>, %arg4: memref<16x128xbf16, #tpu.memory_space<vmem>>, %arg5: memref<1x128xf32, #tpu.memory_space<vmem>>, %arg6: memref<128x128xf32, #tpu.memory_space<vmem>>) attributes {dimension_semantics = [#tpu.dimension_semantics<parallel>], iteration_bounds = array<i64: 2>, scalar_prefetch = 0 : i64, scratch_operands = 0 : i64, tpu.core_type = #tpu.core_type<tc>, window_params = [{transform_indices = @transform_0, window_bounds = array<i64: 128, 32>}, {pipeline_mode = #tpu.pipeline_mode<synchronous>, transform_indices = @transform_1, window_bounds = array<i64: 32, 16>}, {pipeline_mode = #tpu.pipeline_mode<synchronous>, transform_indices = @transform_2, window_bounds = array<i64: 1, 16>}, {pipeline_mode = #tpu.pipeline_mode<synchronous>, transform_indices = @transform_3, window_bounds = array<i64: 16, 128>}, {pipeline_mode = #tpu.pipeline_mode<synchronous>, transform_indices = @transform_4, window_bounds = array<i64: 1, 128>}, {transform_indices = @transform_5, window_bounds = array<i64: 128, 128>}]} {
    %c0 = arith.constant 0 : index
    %c0_0 = arith.constant 0 : index
    %0 = vector.load %arg1[%c0, %c0_0] : memref<128x32xbf16, #tpu.memory_space<vmem>>, vector<128x32xbf16>
    %c0_1 = arith.constant 0 : index
    %c0_2 = arith.constant 0 : index
    %1 = vector.load %arg2[%c0_1, %c0_2] : memref<32x16xbf16, #tpu.memory_space<vmem>>, vector<32x16xbf16>
    %cst = arith.constant dense<0.000000e+00> : vector<128x16xf32>
    %2 = tpu.matmul %0, %1, %cst {dimension_numbers = #tpu.dot_dimension_numbers<[1], [0], [0], [1], [0, 0, 1, 1], [], []>} : vector<128x32xbf16>, vector<32x16xbf16>, vector<128x16xf32> -> vector<128x16xf32>
    %c0_3 = arith.constant 0 : index
    %c0_4 = arith.constant 0 : index
    %3 = vector.load %arg3[%c0_3, %c0_4] : memref<1x16xf32, #tpu.memory_space<vmem>>, vector<1x16xf32>
    %4 = vector.broadcast %3 : vector<1x16xf32> to vector<128x16xf32>
    %5 = arith.addf %2, %4 : vector<128x16xf32>
    %cst_5 = arith.constant 2.000000e+01 : f32
    %6 = vector.broadcast %cst_5 : f32 to vector<128x16xf32>
    %7 = arith.minimumf %5, %6 : vector<128x16xf32>
    %8 = math.exp %7 : vector<128x16xf32>
    %9 = arith.mulf %8, %8 : vector<128x16xf32>
    %cst_6 = arith.constant 2.000000e+00 : f32
    %10 = vector.broadcast %cst_6 : f32 to vector<128x16xf32>
    %11 = arith.mulf %10, %8 : vector<128x16xf32>
    %12 = arith.addf %9, %11 : vector<128x16xf32>
    %cst_7 = arith.constant 2.000000e+00 : f32
    %13 = vector.broadcast %cst_7 : f32 to vector<128x16xf32>
    %14 = arith.addf %12, %13 : vector<128x16xf32>
    %15 = tpu.reciprocal %14 {approx = true} : vector<128x16xf32> -> vector<128x16xf32>
    %cst_8 = arith.constant 2.000000e+00 : f32
    %16 = vector.broadcast %cst_8 : f32 to vector<128x16xf32>
    %17 = arith.mulf %16, %15 : vector<128x16xf32>
    %cst_9 = arith.constant 1.000000e+00 : f32
    %18 = vector.broadcast %cst_9 : f32 to vector<128x16xf32>
    %19 = arith.subf %18, %17 : vector<128x16xf32>
    %cst_10 = arith.constant 2.000000e+01 : f32
    %20 = vector.broadcast %cst_10 : f32 to vector<128x16xf32>
    %21 = arith.cmpf ogt, %5, %20 : vector<128x16xf32>
    %22 = arith.mulf %5, %19 : vector<128x16xf32>
    %23 = arith.select %21, %5, %22 : vector<128x16xi1>, vector<128x16xf32>
    %24 = arith.truncf %23 : vector<128x16xf32> to vector<128x16xbf16>
    %c0_11 = arith.constant 0 : index
    %c0_12 = arith.constant 0 : index
    %25 = vector.load %arg4[%c0_11, %c0_12] : memref<16x128xbf16, #tpu.memory_space<vmem>>, vector<16x128xbf16>
    %cst_13 = arith.constant dense<0.000000e+00> : vector<128x128xf32>
    %26 = tpu.matmul %24, %25, %cst_13 {dimension_numbers = #tpu.dot_dimension_numbers<[1], [0], [0], [1], [0, 0, 1, 1], [], []>} : vector<128x16xbf16>, vector<16x128xbf16>, vector<128x128xf32> -> vector<128x128xf32>
    %c0_14 = arith.constant 0 : index
    %c0_15 = arith.constant 0 : index
    %27 = vector.load %arg5[%c0_14, %c0_15] : memref<1x128xf32, #tpu.memory_space<vmem>>, vector<1x128xf32>
    %28 = vector.broadcast %27 : vector<1x128xf32> to vector<128x128xf32>
    %29 = arith.addf %26, %28 : vector<128x128xf32>
    %c0_16 = arith.constant 0 : index
    %c0_17 = arith.constant 0 : index
    %30 = vector.load %arg6[%c0_16, %c0_17] : memref<128x128xf32, #tpu.memory_space<vmem>>, vector<128x128xf32>
    tpu.vector_store %arg6[%c0_16, %c0_17], %29 {strides = array<i32>} : memref<128x128xf32, #tpu.memory_space<vmem>>, vector<128x128xf32>,
    return
  }
  func.func @transform_0(%arg0: i32) -> (i32, i32) {
    %c0_i32 = arith.constant 0 : i32
    %c0_i32_0 = arith.constant 0 : i32
    return %arg0, %c0_i32 : i32, i32
  }
  func.func @transform_1(%arg0: i32) -> (i32, i32) {
    %c0_i32 = arith.constant 0 : i32
    %c0_i32_0 = arith.constant 0 : i32
    %c0_i32_1 = arith.constant 0 : i32
    return %c0_i32, %c0_i32_0 : i32, i32
  }
  func.func @transform_2(%arg0: i32) -> (i32, i32) {
    %c0_i32 = arith.constant 0 : i32
    %c0_i32_0 = arith.constant 0 : i32
    %c0_i32_1 = arith.constant 0 : i32
    return %c0_i32, %c0_i32_0 : i32, i32
  }
  func.func @transform_3(%arg0: i32) -> (i32, i32) {
    %c0_i32 = arith.constant 0 : i32
    %c0_i32_0 = arith.constant 0 : i32
    %c0_i32_1 = arith.constant 0 : i32
    return %c0_i32, %c0_i32_0 : i32, i32
  }
  func.func @transform_4(%arg0: i32) -> (i32, i32) {
    %c0_i32 = arith.constant 0 : i32
    %c0_i32_0 = arith.constant 0 : i32
    %c0_i32_1 = arith.constant 0 : i32
    return %c0_i32, %c0_i32_0 : i32, i32
  }
  func.func @transform_5(%arg0: i32) -> (i32, i32) {
    %c0_i32 = arith.constant 0 : i32
    %c0_i32_0 = arith.constant 0 : i32
    return %arg0, %c0_i32 : i32, i32
  }
}

</mosaic_0001>

<bundles_post_ra>
// kernel: tpu_custom_call.1
= control target key start
LH: loop header
LB: loop body
LE: loop exit
PB: predicated region body
PF: predicated region fallthrough
CT: control target
= control target key end

     0   :  { %10 = vsyncpa [#allocation3], 0  ;;  %s1492_s0 = inlined_call_operand.vmem [shape: bf16[256,32], index: 0, kind: input, shape index: {}]   ;;  %s1493_s1 = inlined_call_operand.vmem [shape: bf16[32,16], index: 1, kind: input, shape index: {}]   ;;  %s1494_s2 = inlined_call_operand.vmem [shape: f32[1,16], index: 2, kind: input, shape index: {}]   ;;  %s1495_s3 = inlined_call_operand.vmem [shape: bf16[16,128], index: 3, kind: input, shape index: {}]   ;;  %s1496_s4 = inlined_call_operand.vmem [shape: f32[1,128], index: 4, kind: input, shape index: {}]   ;;  %s1497_s5 = inlined_call_operand.hbm [shape: f32[256,128], index: 5, kind: output, shape index: {}]  }
   0x1   :  { %12 = vsyncpa [#allocation3 + $0x1], 0  ;;  %s1185_s18 = smov 0   ;;  %s1187_s19 = smov 0  }
   0x2   :  { %s1189_s20 = smov 0   ;;  %s1191_s21 = smov 0  }
   0x3 LB: > { %s1206_s22 = sadd.s32 4294967295, %s1150_s21   ;;  %s873_s23 = sadd.s32 4294967294, %s1150_s21   ;;  %s1150_s21 = sphi %s1191_s21, %s1503_s21   ;;  %s1146_s20 = sphi %s1189_s20, %s1502_s20   ;;  %s1142_s19 = sphi %s1187_s19, %s1501_s19   ;;  %s1138_s18 = sphi %s1185_s18, %s1500_s18  }
   0x4   : > { %s1210_s24 = sadd.s32 1, %s1150_s21   ;;  %s135_s25 = sadd.s32 1, %s1146_s20 }
   0x5   : > { %s132_s26 = ssub.s32 %s1150_s21, %s1210_s24  ;;  %p145_p0 = scmp.ne.s32.totalorder %s1146_s20, %s1142_s19 }
   0x6   : > { %p133_p1 = scmp.eq.s32.totalorder %s132_s26, 0  ;;  %p146_p2 = scmp.eq.s32.totalorder %s1206_s22, 1 }
   0x7   : > { %p151_p3 = scmp.ne.s32.totalorder %s1142_s19, %s1138_s18  ;;  %p152_p4 = scmp.eq.s32.totalorder %s873_s23, 1 }
   0x8   : > { %s1221_s27 = scalar_select %p133_p1, %s1146_s20, %s135_s25  }
   0x9   : > { %p1223_p5 = por %p146_p2, %p145_p0  ;;  %p1227_p6 = por %p152_p4, %p151_p3 }
   0xa   : > { %p876_p7 = scmp.ge.s32.totalorder %s1150_s21, 1  ;;  %p191_p8 = scmp.lt.s32.totalorder %s1150_s21, 3 }
   0xc   : > { %p192_p9 = pnand %p876_p7, %p191_p8 }
   0xd   : > { %v1013_v0 = vld [vmem:[%s1493_s1] sm:$0xff] (!%p192_p9)   ;;  %s878_s7 = sshll.u32 (!%p192_p9), %s1206_s22, 4  ;;  %v1014_v1 = vld [vmem:[%s1493_s1 + $0x8] sm:$0xff] (!%p192_p9)   ;;  %vm306_vm0 = vcmask (!%p192_p9), 261120   ;;  %vm659_vm13 = vcmask (!%p192_p9), 130048   ;;  %s216_s23 = sand.u32 (!%p192_p9), 1, %s1142_s19  }
   0xe   : > { %195 = sbr.rel (%p192_p9) target bundleno = 563 (0x233), region = 40  ;;  %p220_p10 = scmp.lt.s32.totalorder (!%p192_p9), %s878_s7, 31  ;;  %934 = vmatprep.subr.bf16.mxu0 (!%p192_p9), %v1013_v0  ;;  %v1023_v10 = vld [vmem:[%s1495_s3] sm:$0xff] (!%p192_p9)  }
   0xf   : > { %935 = vmatpush3.bf16.msra.mxu0 (!%p192_p9), %v1013_v0  ;;  %954 = vmatprep.subr.bf16.mxu1 (!%p192_p9), %v1023_v10  ;;  %v1257_v11 = vld [vmem:[%s1494_s2] ss:$0 sm:$0xff] (!%p192_p9)  ;;  %s877_s25 = sshll.u32 (!%p192_p9), %s216_s23, 7 }
  0x10   : > { %936 = vmatprep.subr.bf16.mxu0 (!%p192_p9), %v1014_v1  ;;  %955 = vmatpush3.bf16.msra.mxu1 (!%p192_p9), %v1023_v10  ;;  %s1422_s6 = scalar_lea.vmem (!%p192_p9), [#allocation2], %s877_s25 }
  0x11   : > { %s811_s8 = sshll.u32 (!%p192_p9), %s1422_s6, 4  ;;  %s1444_s8 = int_to_ptr.vmem [resolvable:$true] %s811_s8 }
  0x12   : > { %s1088_s12 = scalar_lea.vmem (!%p192_p9), %s1444_s8, 2048 }
  0x13   : > { %937 = vmatpush3.bf16.msra.mxu0 (!%p192_p9), %v1014_v1  ;;  %p1089_p11 = scmp.ne.s32.totalorder (!%p192_p9), %s1444_s8, %s1088_s12 }
  0x15   : > { %s1505_s7 = smov (!%p220_p10, %s878_s7), 31  ;;  %p1090_p12 = pnand %p1089_p11, %p1223_p5 }
  0x16   : > { %s879_s10 = sshll.u32 %s1505_s7, 2  ;;  %s914_s7 = sshll.u32 %s1206_s22, 11 }
  0x17   : > { %s223_s13 = scalar_lea.vmem %s1492_s0, %s879_s10  ;;  %s1442_s11 = scalar_lea.hbm %s1497_s5, %s914_s7 }
  0x18   : > { %v1015_v2 = vld [vmem:[%s223_s13] sm:$0xff]   ;;  %v1016_v3 = vld [vmem:[%s223_s13 + $0x8] sm:$0xff]   ;;  %v1017_v4 = vld [vmem:[%s223_s13 + $0x10] sm:$0xff]   ;;  %s1451_s22 = scalar_lea.sflag [#allocation3], %s216_s23  ;;  %p1091_p13 = pneg %p1090_p12 }
  0x19   : > { %938 = vmatprep.mubr.msk.bf16.mxu0 %vm306_vm0, %v1015_v2  ;;  %v1018_v5 = vld [vmem:[%s223_s13 + $0x18] sm:$0xff]   ;;  %v1019_v6 = vld [vmem:[%s223_s13 + $0x20] sm:$0xff]   ;;  %v1020_v7 = vld [vmem:[%s223_s13 + $0x28] sm:$0xff]  }
  0x1a   : > { %939 = vmatmul.mubr.msk.bf16.vlgmr.msra.gmra.mrb[0].mxu0 %vm306_vm0, %v1016_v3  ;;  %v1021_v8 = vld [vmem:[%s223_s13 + $0x30] sm:$0xff]   ;;  %v1022_v9 = vld [vmem:[%s223_s13 + $0x38] sm:$0xff]   ;;  %s1152_s13 = smov [#allocation2]  }
  0x1b   : > { %942 = vmatprep.mubr.msk.bf16.mxu0 %vm306_vm0, %v1017_v4  ;;  %s1092_s14 = sshll.u32 %s1152_s13, 4  ;;  %s1093_s14 = int_to_ptr.vmem [resolvable:$false] %s1092_s14 }
  0x1c   : > { %s1094_s15 = scalar_lea.vmem %s1093_s14, 4096  ;;  %p1095_p0 = scmp.lt.s32.totalorder %s1444_s8, %s1093_s14 }
  0x1d   : > { %p1096_p1 = scmp.lt.s32.totalorder %s1094_s15, %s1088_s12 }
  0x1f   : > { %p1097_p2 = por %p1096_p1, %p1095_p0 }
  0x21   : > { %p1098_p3 = pnand %p1097_p2, %p1091_p13 }
  0x22   : > { %943 = vmatmul.mubr.msk.bf16.gmra.mrb[4].mxu0 %vm306_vm0, %v1018_v5 }
  0x23   : > { %946 = vmatprep.mubr.msk.bf16.mxu0 %vm306_vm0, %v1019_v6 }
  0x2a   : > { %947 = vmatmul.mubr.msk.bf16.gmra.mrb[8].mxu0 %vm306_vm0, %v1020_v7 }
  0x2b   : > { %950 = vmatprep.mubr.msk.bf16.mxu0 %vm306_vm0, %v1021_v8 }
  0x32   : > { %951 = vmatmul.mubr.msk.bf16.gmra.mrb[12].mxu0 %vm306_vm0, %v1022_v9 }
  0xed   : > { %v940_v12 = vpop.f32.mrb[0].mxu0 }
  0xee   : > { %v1260_v13 = vadd.f32 %v940_v12, %v1257_v11  ;;  %v365_v14 = vpop.f32.mrb[1].mxu0 }
  0xef   : > { %v1263_v15 = vadd.f32 %v1257_v11, %v365_v14  ;;  %v941_v16 = vpop.f32.mrb[2].mxu0 }
  0xf0   : > { %v430_v17 = vmin.f32 %v1260_v13, 20.0  ;;  %v1267_v18 = vadd.f32 %v941_v16, %v1257_v11  ;;  %v368_v19 = vpop.f32.mrb[3].mxu0  ;;  %vm590_vm1 = vcmp.gt.f32.partialorder %v1260_v13, 20.0 }
  0xf1   : > { %v428_v20 = vmin.f32 %v1263_v15, 20.0  ;;  %v1271_v21 = vadd.f32 %v1257_v11, %v368_v19  ;;  %vm588_vm11 = vcmp.gt.f32.partialorder %v1263_v15, 20.0 }
  0xf2   : > { %v448_v22 = vmul.f32 1.442695, %v430_v17  ;;  %v431_v23 = vmin.f32 %v1267_v18, 20.0  ;;  %vm591_vm2 = vcmp.gt.f32.partialorder %v1267_v18, 20.0 }
  0xf3   : > { %v429_v24 = vmin.f32 %v1271_v21, 20.0  ;;  %v444_v26 = vmul.f32 1.442695, %v428_v20  ;;  %vm589_vm12 = vcmp.gt.f32.partialorder %v1271_v21, 20.0 }
  0xf4   : > { %1024 = vpow2.f32 %v448_v22  ;;  %v450_v25 = vmul.f32 1.442695, %v431_v23 }
  0xf5   : > { %v944_v27 = vpop.f32.mrb[4].mxu0  ;;  %v446_v30 = vmul.f32 1.442695, %v429_v24 }
  0xf6   : > { %1026 = vpow2.f32 %v450_v25  ;;  %v1276_v28 = vadd.f32 %v944_v27, %v1257_v11  ;;  %v381_v29 = vpop.f32.mrb[5].mxu0 }
  0xf7   : > { %v1279_v31 = vadd.f32 %v1257_v11, %v381_v29  ;;  %v945_v32 = vpop.f32.mrb[6].mxu0  ;;  %1028 = vpow2.f32 %v444_v26 }
  0xf8   : > { %v434_v33 = vmin.f32 %v1276_v28, 20.0  ;;  %v1283_v34 = vadd.f32 %v945_v32, %v1257_v11  ;;  %v384_v35 = vpop.f32.mrb[7].mxu0  ;;  %1030 = vpow2.f32 %v446_v30  ;;  %vm594_vm3 = vcmp.gt.f32.partialorder %v1276_v28, 20.0 }
  0xf9   : > { %v432_v36 = vmin.f32 %v1279_v31, 20.0  ;;  %v1287_v37 = vadd.f32 %v1257_v11, %v384_v35  ;;  %vm592_vm4 = vcmp.gt.f32.partialorder %v1279_v31, 20.0 }
  0xfa   : > { %v456_v38 = vmul.f32 1.442695, %v434_v33  ;;  %v435_v39 = vmin.f32 %v1283_v34, 20.0  ;;  %vm595_vm5 = vcmp.gt.f32.partialorder %v1283_v34, 20.0 }
  0xfb   : > { %v452_v40 = vmul.f32 1.442695, %v432_v36  ;;  %v433_v41 = vmin.f32 %v1287_v37, 20.0  ;;  %vm593_vm6 = vcmp.gt.f32.partialorder %v1287_v37, 20.0 }
  0xfc   : > { %1032 = vpow2.f32 %v456_v38  ;;  %v458_v42 = vmul.f32 1.442695, %v435_v39 }
  0xfd   : > { %1034 = vpow2.f32 %v452_v40  ;;  %v454_v43 = vmul.f32 1.442695, %v433_v41  ;;  %v948_v44 = vpop.f32.mrb[8].mxu0 }
  0xfe   : > { %v1025_v45 = vpop.eup %1024  ;;  %1036 = vpow2.f32 %v458_v42  ;;  %v1292_v46 = vadd.f32 %v948_v44, %v1257_v11  ;;  %v397_v47 = vpop.f32.mrb[9].mxu0 }
  0xff   : > { %v478_v48 = vmul.f32 %v1025_v45, %v1025_v45  ;;  %v494_v49 = vmul.f32 2.0, %v1025_v45  ;;  %1038 = vpow2.f32 %v454_v43  ;;  %v1295_v50 = vadd.f32 %v1257_v11, %v397_v47  ;;  %v949_v51 = vpop.f32.mrb[10].mxu0 }
 0x100   : > { %v1027_v52 = vpop.eup %1026  ;;  %v438_v53 = vmin.f32 %v1292_v46, 20.0  ;;  %v1299_v54 = vadd.f32 %v949_v51, %v1257_v11  ;;  %v400_v55 = vpop.f32.mrb[11].mxu0  ;;  %vm598_vm7 = vcmp.gt.f32.partialorder %v1292_v46, 20.0 }
 0x101   : > { %v510_v56 = vadd.f32 %v494_v49, %v478_v48  ;;  %v479_v57 = vmul.f32 %v1027_v52, %v1027_v52  ;;  %v495_v58 = vmul.f32 2.0, %v1027_v52  ;;  %v436_v59 = vmin.f32 %v1295_v50, 20.0  ;;  %v1029_v62 = vpop.eup %1028 }
 0x102   : > { %v464_v60 = vmul.f32 1.442695, %v438_v53  ;;  %v439_v61 = vmin.f32 %v1299_v54, 20.0  ;;  %v1304_v2 = vadd.f32 %v1257_v11, %v400_v55  ;;  %v1031_v4 = vpop.eup %1030  ;;  %v1310_v12 = vmul.f32 %v1029_v62, %v1029_v62 }
 0x103   : > { %v526_v63 = vadd.f32 2.0, %v510_v56  ;;  %v511_v0 = vadd.f32 %v495_v58, %v479_v57  ;;  %v460_v1 = vmul.f32 1.442695, %v436_v59  ;;  %v477_v42 = vmul.f32 %v1031_v4, %v1031_v4 }
 0x104   : > { %1040 = vpow2.f32 %v464_v60  ;;  %v466_v3 = vmul.f32 1.442695, %v439_v61  ;;  %v437_v6 = vmin.f32 %v1304_v2, 20.0  ;;  %v492_v49 = vmul.f32 2.0, %v1029_v62 }
 0x105   : > { %1042 = vrcp.f32 %v526_v63  ;;  %v527_v5 = vadd.f32 2.0, %v511_v0  ;;  %v952_v7 = vpop.f32.mrb[12].mxu0  ;;  %v493_v55 = vmul.f32 2.0, %v1031_v4  ;;  %vm596_vm8 = vcmp.gt.f32.partialorder %v1295_v50, 20.0 }
 0x106   : > { %v1033_v8 = vpop.eup %1032  ;;  %1044 = vpow2.f32 %v460_v1  ;;  %v1308_v9 = vadd.f32 %v952_v7, %v1257_v11  ;;  %v413_v10 = vpop.f32.mrb[13].mxu0  ;;  %v462_v19 = vmul.f32 1.442695, %v437_v6  ;;  %vm599_vm9 = vcmp.gt.f32.partialorder %v1299_v54, 20.0 }
 0x107   : > { %v1035_v14 = vpop.eup %1034  ;;  %1046 = vrcp.f32 %v527_v5  ;;  %v482_v16 = vmul.f32 %v1033_v8, %v1033_v8  ;;  %v498_v17 = vmul.f32 2.0, %v1033_v8  ;;  %v953_v20 = vpop.f32.mrb[14].mxu0  ;;  %v1314_v41 = vadd.f32 %v1257_v11, %v413_v10 }
 0x108   : > { %v1037_v22 = vpop.eup %1036  ;;  %v480_v23 = vmul.f32 %v1035_v14, %v1035_v14  ;;  %v496_v24 = vmul.f32 2.0, %v1035_v14  ;;  %1048 = vpow2.f32 %v466_v3  ;;  %v442_v25 = vmin.f32 %v1308_v9, 20.0  ;;  %v416_v26 = vpop.f32.mrb[15].mxu0 }
 0x109   : > { %v1039_v27 = vpop.eup %1038  ;;  %v514_v29 = vadd.f32 %v498_v17, %v482_v16  ;;  %v483_v30 = vmul.f32 %v1037_v22, %v1037_v22  ;;  %v499_v32 = vmul.f32 2.0, %v1037_v22  ;;  %1050 = vpow2.f32 %v462_v19 }
 0x10a   : > { %v512_v33 = vadd.f32 %v496_v24, %v480_v23  ;;  %v481_v35 = vmul.f32 %v1039_v27, %v1039_v27  ;;  %v497_v36 = vmul.f32 2.0, %v1039_v27  ;;  %v472_v38 = vmul.f32 1.442695, %v442_v25 }
 0x10b   : > { %v530_v39 = vadd.f32 2.0, %v514_v29  ;;  %v515_v40 = vadd.f32 %v499_v32, %v483_v30  ;;  %v1317_v45 = vadd.f32 %v953_v20, %v1257_v11  ;;  %v440_v48 = vmin.f32 %v1314_v41, 20.0 }
 0x10c   : > { %v528_v43 = vadd.f32 2.0, %v512_v33  ;;  %v513_v44 = vadd.f32 %v497_v36, %v481_v35  ;;  %1052 = vpow2.f32 %v472_v38  ;;  %v1322_v0 = vadd.f32 %v1257_v11, %v416_v26 }
 0x10d   : > { %1054 = vrcp.f32 %v530_v39  ;;  %v531_v47 = vadd.f32 2.0, %v515_v40  ;;  %v443_v53 = vmin.f32 %v1317_v45, 20.0  ;;  %v468_v59 = vmul.f32 1.442695, %v440_v48 }
 0x10e   : > { %v1041_v51 = vpop.eup %1040  ;;  %1056 = vrcp.f32 %v528_v43  ;;  %v529_v52 = vadd.f32 2.0, %v513_v44  ;;  %v441_v8 = vmin.f32 %v1322_v0, 20.0  ;;  %v508_v23 = vadd.f32 %v492_v49, %v1310_v12 }
 0x10f   : > { %v1043_v56 = vpop.eup %1042  ;;  %1058 = vrcp.f32 %v531_v47  ;;  %v486_v57 = vmul.f32 %v1041_v51, %v1041_v51  ;;  %v502_v58 = vmul.f32 2.0, %v1041_v51  ;;  %v474_v63 = vmul.f32 1.442695, %v443_v53 }
 0x110   : > { %v1045_v60 = vpop.eup %1044  ;;  %v558_v61 = vmul.f32 2.0, %v1043_v56  ;;  %1060 = vrcp.f32 %v529_v52  ;;  %v470_v26 = vmul.f32 1.442695, %v441_v8  ;;  %v509_v32 = vadd.f32 %v493_v55, %v477_v42 }
 0x111   : > { %v1047_v1 = vpop.eup %1046  ;;  %v518_v62 = vadd.f32 %v502_v58, %v486_v57  ;;  %v484_v3 = vmul.f32 %v1045_v60, %v1045_v60  ;;  %v500_v5 = vmul.f32 2.0, %v1045_v60  ;;  %1062 = vpow2.f32 %v468_v59 }
 0x112   : > { %v1049_v6 = vpop.eup %1048  ;;  %v574_v7 = vsub.f32 1.0, %v558_v61  ;;  %v559_v4 = vmul.f32 2.0, %v1047_v1  ;;  %1064 = vpow2.f32 %v474_v63  ;;  %v524_v43 = vadd.f32 2.0, %v508_v23 }
 0x113   : > { %v1051_v10 = vpop.eup %1050  ;;  %v534_v14 = vadd.f32 2.0, %v518_v62  ;;  %v516_v16 = vadd.f32 %v500_v5, %v484_v3  ;;  %v487_v17 = vmul.f32 %v1049_v6, %v1049_v6  ;;  %v503_v19 = vmul.f32 2.0, %v1049_v6 }
 0x114   : > { %v575_v20 = vsub.f32 1.0, %v559_v4  ;;  %v485_v22 = vmul.f32 %v1051_v10, %v1051_v10  ;;  %v501_v11 = vmul.f32 2.0, %v1051_v10  ;;  %v606_v29 = vmul.f32 %v574_v7, %v1260_v13 }
 0x115   : > { %1066 = vrcp.f32 %v534_v14  ;;  %v532_v24 = vadd.f32 2.0, %v516_v16  ;;  %v519_v25 = vadd.f32 %v503_v19, %v487_v17  ;;  %v525_v53 = vadd.f32 2.0, %v509_v32 }
 0x116   : > { %v1053_v27 = vpop.eup %1052  ;;  %v517_v30 = vadd.f32 %v501_v11, %v485_v22  ;;  %v607_v47 = vmul.f32 %v575_v20, %v1267_v18  ;;  %v1341_v14 = vsel %vm590_vm1, %v1260_v13, %v606_v29  ;;  %vm597_vm10 = vcmp.gt.f32.partialorder %v1304_v2, 20.0 }
 0x117   : > { %v1055_v33 = vpop.eup %1054  ;;  %1068 = vrcp.f32 %v532_v24  ;;  %v535_v35 = vadd.f32 2.0, %v519_v25  ;;  %v490_v36 = vmul.f32 %v1053_v27, %v1053_v27  ;;  %v506_v38 = vmul.f32 2.0, %v1053_v27 }
 0x118   : > { %v1057_v39 = vpop.eup %1056  ;;  %v562_v12 = vmul.f32 2.0, %v1055_v33  ;;  %v533_v40 = vadd.f32 2.0, %v517_v30  ;;  %1070 = vpow2.f32 %v470_v26  ;;  %v1346_v16 = vsel %vm591_vm2, %v1267_v18, %v607_v47 }
 0x119   : > { %v1059_v44 = vpop.eup %1058  ;;  %v560_v42 = vmul.f32 2.0, %v1057_v39  ;;  %1072 = vrcp.f32 %v535_v35  ;;  %v522_v48 = vadd.f32 %v506_v38, %v490_v36  ;;  %v637_v22 = vpack.c.bf16 %v1346_v16, %v1341_v14 }
 0x11a   : > { %v1061_v49 = vpop.eup %1060  ;;  %v578_v51 = vsub.f32 1.0, %v562_v12  ;;  %v563_v52 = vmul.f32 2.0, %v1059_v44  ;;  %1074 = vrcp.f32 %v533_v40  ;;  %vm602_vm14 = vcmp.gt.f32.partialorder %v1308_v9, 20.0 }
 0x11b   : > { %v1063_v55 = vpop.eup %1062  ;;  %v576_v56 = vsub.f32 1.0, %v560_v42  ;;  %v561_v57 = vmul.f32 2.0, %v1061_v49  ;;  %v538_v58 = vadd.f32 2.0, %v522_v48  ;;  %1076 = vrcp.f32 %v524_v43 }
 0x11c   : > { %v1065_v59 = vpop.eup %1064  ;;  %v610_v60 = vmul.f32 %v578_v51, %v1276_v28  ;;  %v579_v61 = vsub.f32 1.0, %v563_v52  ;;  %v488_v63 = vmul.f32 %v1063_v55, %v1063_v55  ;;  %v504_v1 = vmul.f32 2.0, %v1063_v55 }
 0x11d   : > { %v608_v62 = vmul.f32 %v576_v56, %v1279_v31  ;;  %v577_v3 = vsub.f32 1.0, %v561_v57  ;;  %1078 = vrcp.f32 %v538_v58  ;;  %v491_v5 = vmul.f32 %v1065_v59, %v1065_v59 }
 0x11e   : > { %v611_v6 = vmul.f32 %v579_v61, %v1283_v34  ;;  %v520_v7 = vadd.f32 %v504_v1, %v488_v63  ;;  %v507_v4 = vmul.f32 2.0, %v1065_v59  ;;  %1080 = vrcp.f32 %v525_v53 }
 0x11f   : > { %v1067_v8 = vpop.eup %1066  ;;  %v609_v10 = vmul.f32 %v577_v3, %v1287_v37  ;;  %v1353_v23 = vsel %vm592_vm4, %v1279_v31, %v608_v62  ;;  %v1361_v18 = vsel %vm594_vm3, %v1276_v28, %v610_v60  ;;  %vm603_vm15 = vcmp.gt.f32.partialorder %v1317_v45, 20.0 }
 0x120   : > { %v566_v17 = vmul.f32 2.0, %v1067_v8  ;;  %v536_v19 = vadd.f32 2.0, %v520_v7  ;;  %v523_v20 = vadd.f32 %v507_v4, %v491_v5  ;;  %v1366_v24 = vsel %vm595_vm5, %v1283_v34, %v611_v6 }
 0x121   : > { %v1069_v11 = vpop.eup %1068  ;;  %v1356_v13 = vsel %vm593_vm6, %v1287_v37, %v609_v10  ;;  %v639_v28 = vpack.c.bf16 %v1366_v24, %v1361_v18  ;;  %vm600_vm0 = vcmp.gt.f32.partialorder %v1314_v41, 20.0  ;;  %vm601_vm1 = vcmp.gt.f32.partialorder %v1322_v0, 20.0 }
 0x122   : > { %v1071_v25 = vpop.eup %1070  ;;  %v582_v26 = vsub.f32 1.0, %v566_v17  ;;  %v564_v27 = vmul.f32 2.0, %v1069_v11  ;;  %1082 = vrcp.f32 %v536_v19  ;;  %v539_v29 = vadd.f32 2.0, %v523_v20 }
 0x123   : > { %v1073_v31 = vpop.eup %1072  ;;  %v489_v30 = vmul.f32 %v1071_v25, %v1071_v25  ;;  %v505_v32 = vmul.f32 2.0, %v1071_v25  ;;  %v638_v37 = vpack.c.bf16 %v1356_v13, %v1353_v23 }
 0x124   : > { %v1075_v33 = vpop.eup %1074  ;;  %v580_v35 = vsub.f32 1.0, %v564_v27  ;;  %v567_v36 = vmul.f32 2.0, %v1073_v31  ;;  %1084 = vrcp.f32 %v539_v29  ;;  %v614_v12 = vmul.f32 %v582_v26, %v1292_v46 }
 0x125   : > { %v1077_v34 = vpop.eup %1076  ;;  %v565_v38 = vmul.f32 2.0, %v1075_v33  ;;  %v521_v39 = vadd.f32 %v505_v32, %v489_v30 }
 0x126   : > { %v612_v40 = vmul.f32 %v580_v35, %v1295_v50  ;;  %v583_v43 = vsub.f32 1.0, %v567_v36  ;;  %v556_v44 = vmul.f32 2.0, %v1077_v34  ;;  %v630_v58 = vsel %vm598_vm7, %v1292_v46, %v614_v12 }
 0x127   : > { %v1079_v47 = vpop.eup %1078  ;;  %v581_v42 = vsub.f32 1.0, %v565_v38  ;;  %v537_v48 = vadd.f32 2.0, %v521_v39 }
 0x128   : > { %v1081_v49 = vpop.eup %1080  ;;  %v615_v51 = vmul.f32 %v583_v43, %v1299_v54  ;;  %v572_v52 = vsub.f32 1.0, %v556_v44  ;;  %v570_v55 = vmul.f32 2.0, %v1079_v47  ;;  %v628_v57 = vsel %vm596_vm8, %v1295_v50, %v612_v40 }
 0x129   : > { %v613_v53 = vmul.f32 %v581_v42, %v1304_v2  ;;  %1086 = vrcp.f32 %v537_v48  ;;  %v557_v56 = vmul.f32 2.0, %v1081_v49 }
 0x12a   : > { %v631_v59 = vsel %vm599_vm9, %v1299_v54, %v615_v51  ;;  %v604_v61 = vmul.f32 %v572_v52, %v1263_v15  ;;  %v586_v5 = vsub.f32 1.0, %v570_v55 }
 0x12b   : > { %v573_v60 = vsub.f32 1.0, %v557_v56  ;;  %v629_v63 = vsel %vm597_vm10, %v1304_v2, %v613_v53  ;;  %v641_v1 = vpack.c.bf16 %v631_v59, %v630_v58 }
 0x12c   : > { %v1083_v62 = vpop.eup %1082  ;;  %v640_v3 = vpack.c.bf16 %v629_v63, %v628_v57  ;;  %v620_v50 = vsel %vm588_vm11, %v1263_v15, %v604_v61  ;;  %v618_v2 = vmul.f32 %v586_v5, %v1308_v9 }
 0x12d   : > { %v605_v6 = vmul.f32 %v573_v60, %v1271_v21  ;;  %v568_v4 = vmul.f32 2.0, %v1083_v62 }
 0x12e   : > { %v1085_v7 = vpop.eup %1084 }
 0x12f   : > { %v571_v46 = vmul.f32 2.0, %v1085_v7  ;;  %v621_v54 = vsel %vm589_vm12, %v1271_v21, %v605_v6  ;;  %v584_v17 = vsub.f32 1.0, %v568_v4  ;;  %v634_v21 = vsel %vm602_vm14, %v1308_v9, %v618_v2 }
 0x130   : > { %v636_v8 = vpack.c.bf16 %v621_v54, %v620_v50 }
 0x131   : > { %v587_v10 = vsub.f32 1.0, %v571_v46  ;;  %v616_v23 = vmul.f32 %v584_v17, %v1314_v41 }
 0x132   : > { %956 = vmatprep.mubr.msk.bf16.mxu1 %vm659_vm13, %v636_v8 }
 0x133   : > { %v1087_v19 = vpop.eup %1086  ;;  %v619_v20 = vmul.f32 %v587_v10, %v1317_v45  ;;  %957 = vmatmul.mubr.msk.bf16.vlgmr.msra.gmra.mrb[0].mxu1 %vm659_vm13, %v637_v22  ;;  %v632_v16 = vsel %vm600_vm0, %v1314_v41, %v616_v23  ;;  %v899_v41 = vld [vmem:[%s1496_s4] ss:$0 sm:$0xff] }
 0x134   : > { %v569_v15 = vmul.f32 2.0, %v1087_v19  ;;  %960 = vmatprep.mubr.msk.bf16.mxu1 %vm659_vm13, %v638_v37 }
 0x135   : > { %v635_v11 = vsel %vm603_vm15, %v1317_v45, %v619_v20 }
 0x136   : > { %v585_v13 = vsub.f32 1.0, %v569_v15  ;;  %v643_v25 = vpack.c.bf16 %v635_v11, %v634_v21 }
 0x138   : > { %v617_v14 = vmul.f32 %v585_v13, %v1322_v0 }
 0x13a   : > { %v633_v22 = vsel %vm601_vm1, %v1322_v0, %v617_v14 }
 0x13b   : > { %961 = vmatmul.mubr.msk.bf16.gmra.mrb[4].mxu1 %vm659_vm13, %v639_v28  ;;  %v642_v9 = vpack.c.bf16 %v633_v22, %v632_v16 }
 0x13c   : > { %964 = vmatprep.mubr.msk.bf16.mxu1 %vm659_vm13, %v640_v3 }
 0x143   : > { %965 = vmatmul.mubr.msk.bf16.gmra.mrb[8].mxu1 %vm659_vm13, %v641_v1 }
 0x144   : > { %968 = vmatprep.mubr.msk.bf16.mxu1 %vm659_vm13, %v642_v9 }
 0x14b   : > { %969 = vmatmul.mubr.msk.bf16.gmra.mrb[12].mxu1 %vm659_vm13, %v643_v25 }
 0x206   : > { %v958_v45 = vpop.f32.mrb[0].mxu1 }
 0x207   : > { %v727_v0 = vadd.f32 %v958_v45, %v899_v41  ;;  %v718_v18 = vpop.f32.mrb[1].mxu1 }
 0x208   : > { %v719_v24 = vadd.f32 %v899_v41, %v718_v18  ;;  %v959_v26 = vpop.f32.mrb[2].mxu1 }
 0x209   : > { %783 = vst [vmem:[%s1422_s6 + $0x10] sm:$0xff] %v727_v0  ;;  %v730_v27 = vadd.f32 %v959_v26, %v899_v41  ;;  %v721_v29 = vpop.f32.mrb[3].mxu1 }
 0x20a   : > { %781 = vst [vmem:[%s1422_s6] sm:$0xff] %v719_v24  ;;  %v722_v31 = vadd.f32 %v899_v41, %v721_v29 }
 0x20b   : > { %784 = vst [vmem:[%s1422_s6 + $0x18] sm:$0xff] %v730_v27 }
 0x20c   : > { %782 = vst [vmem:[%s1422_s6 + $0x8] sm:$0xff] %v722_v31 }
 0x20e   : > { %v962_v30 = vpop.f32.mrb[4].mxu1 }
 0x20f   : > { %v743_v32 = vadd.f32 %v962_v30, %v899_v41  ;;  %v734_v37 = vpop.f32.mrb[5].mxu1 }
 0x210   : > { %v735_v28 = vadd.f32 %v899_v41, %v734_v37  ;;  %v963_v33 = vpop.f32.mrb[6].mxu1 }
 0x211   : > { %787 = vst [vmem:[%s1422_s6 + $0x30] sm:$0xff] %v743_v32  ;;  %v746_v35 = vadd.f32 %v963_v33, %v899_v41  ;;  %v737_v36 = vpop.f32.mrb[7].mxu1 }
 0x212   : > { %785 = vst [vmem:[%s1422_s6 + $0x20] sm:$0xff] %v735_v28  ;;  %v738_v34 = vadd.f32 %v899_v41, %v737_v36 }
 0x213   : > { %788 = vst [vmem:[%s1422_s6 + $0x38] sm:$0xff] %v746_v35 }
 0x214   : > { %786 = vst [vmem:[%s1422_s6 + $0x28] sm:$0xff] %v738_v34 }
 0x216   : > { %v966_v38 = vpop.f32.mrb[8].mxu1 }
 0x217   : > { %v759_v39 = vadd.f32 %v966_v38, %v899_v41  ;;  %v750_v12 = vpop.f32.mrb[9].mxu1 }
 0x218   : > { %v751_v40 = vadd.f32 %v899_v41, %v750_v12  ;;  %v967_v43 = vpop.f32.mrb[10].mxu1 }
 0x219   : > { %791 = vst [vmem:[%s1422_s6 + $0x50] sm:$0xff] %v759_v39  ;;  %v762_v44 = vadd.f32 %v967_v43, %v899_v41  ;;  %v753_v47 = vpop.f32.mrb[11].mxu1 }
 0x21a   : > { %789 = vst [vmem:[%s1422_s6 + $0x40] sm:$0xff] %v751_v40  ;;  %v754_v42 = vadd.f32 %v899_v41, %v753_v47 }
 0x21b   : > { %792 = vst [vmem:[%s1422_s6 + $0x58] sm:$0xff] %v762_v44 }
 0x21c   : > { %790 = vst [vmem:[%s1422_s6 + $0x48] sm:$0xff] %v754_v42 }
 0x21e   : > { %v970_v48 = vpop.f32.mrb[12].mxu1 }
 0x21f   : > { %v775_v49 = vadd.f32 %v970_v48, %v899_v41  ;;  %v766_v51 = vpop.f32.mrb[13].mxu1 }
 0x220   : > { %v767_v52 = vadd.f32 %v899_v41, %v766_v51  ;;  %v971_v53 = vpop.f32.mrb[14].mxu1 }
 0x221   : > { %795 = vst [vmem:[%s1422_s6 + $0x70] sm:$0xff] %v775_v49  ;;  %v778_v55 = vadd.f32 %v971_v53, %v899_v41  ;;  %v769_v56 = vpop.f32.mrb[15].mxu1 }
 0x222   : > { %793 = vst [vmem:[%s1422_s6 + $0x60] sm:$0xff] %v767_v52  ;;  %v770_v57 = vadd.f32 %v899_v41, %v769_v56 }
 0x223   : > { %796 = vst [vmem:[%s1422_s6 + $0x78] sm:$0xff] %v778_v55 }
 0x224   : > { %794 = vst [vmem:[%s1422_s6 + $0x68] sm:$0xff] %v770_v57 }
 0x225   : > { %1101 = shalt.err (!%p1098_p3)
}
 0x226   : > { %s1102_s16 = scalar_lea.hbm %s1442_s11, 2048  ;;  %s1106_s25 = scalar_lea.hbm %s1497_s5, 4096 }
 0x227   : > { %p1103_p4 = scmp.ne.s32.totalorder %s1442_s11, %s1102_s16  ;;  %p1107_p9 = scmp.lt.u32.totalorder %s1442_s11, %s1497_s5 }
 0x228   : > { %p1108_p10 = scmp.lt.u32.totalorder %s1106_s25, %s1102_s16  ;;  %p1110_p12 = scmp.lt.u32.totalorder %s1102_s16, %s1442_s11 }
 0x229   : > { %p1104_p7 = pnand %p1103_p4, %p1223_p5 }
 0x22a   : > { %p1109_p11 = por %p1108_p10, %p1107_p9 }
 0x22b   : > { %p1105_p8 = pneg %p1104_p7 }
 0x22c   : > { %p1111_p13 = por %p1110_p12, %p1109_p11 }
 0x22e   : > { %p1112_p0 = pnand %p1111_p13, %p1105_p8 }
 0x230   : > { %1115 = shalt.err (!%p1112_p0)
}
 0x231   : > { %s1153_s6 = smov 128   ;;  %s1154_s7 = smov 8  }
 0x232   : > { %972 = dma.vmem_to_hbm [thread:$0]  (%p1223_p5), %s1444_s8, 2048, %s1442_s11, %s1451_s22, %s1153_s6, %s1153_s6, %s1154_s7  }
 0x233 PF: > { %p978_p1 = scmp.ge.s32.totalorder %s1150_s21, 2  ;;  %s826_s9 = sand.u32 1, %s1138_s18  }
 0x234   : > { %s827_s10 = scalar_lea.sflag [#allocation3], %s826_s9 }
 0x235   : > { %p975_p2 = pnand %p978_p1, %p1227_p6 }
 0x237   : > { %1133 = dma.done.wait (!%p975_p2), %s827_s10, 2048  }
 0x238   : > { %1135 = vsyncadd (!%p975_p2), %s827_s10, 4294965248  ;;  %p15_p3 = scmp.ge.s32.totalorder %s1210_s24, 4   ;;  %s1500_s18 = smov %s1142_s19 }
 0x239   : > { %s1501_s19 = smov %s1146_s20  ;;  %s1502_s20 = smov %s1221_s27 }
 0x23a   : > { %s1503_s21 = smov %s1210_s24  ;;  %17 = sbr.rel (!%p15_p3) target bundleno = 3 (0x3), region = 75 }
 0x241   :  { %832 = vsyncpa [#allocation3], 1 }
 0x242   :  { %834 = vsyncpa [#allocation3 + $0x1], 1 }

</bundles_post_ra>
